<compile_context>
chip_gen: v7x
topology: tpu7x:2x2x1
jax: 0.10.0
libtpu: 0.0.40
codegen_flags: <defaults>
</compile_context>

<pallas_src>
from functools import partial

import numpy as np
import jax
import jax.numpy as jnp
from jax.experimental import pallas as pl
from jax.experimental.pallas import tpu as pltpu


# ----------------------- exact torch AdaptiveAvgPool3d matrix -------------------
def _adaptive_pool_matrix(in_size: int, out_size: int) -> np.ndarray:
    """P[o, i] = 1/len(range_o) for i in torch's AdaptiveAvgPool range of o."""
    P = np.zeros((out_size, in_size), dtype=np.float64)
    for o in range(out_size):
        start = (o * in_size) // out_size
        end = -((-(o + 1) * in_size) // out_size)      # ceil((o+1)*in/out)
        P[o, start:end] = 1.0 / (end - start)
    return P


def _pool3d_matrix(D: int, H: int, W: int, out=(2, 3, 3)) -> np.ndarray:
    Pd = _adaptive_pool_matrix(D, out[0])
    Ph = _adaptive_pool_matrix(H, out[1])
    Pw = _adaptive_pool_matrix(W, out[2])
    # Pt[(d,h,w), (od,oh,ow)] = Pd[od,d] * Ph[oh,h] * Pw[ow,w]
    P = np.einsum("ad,bh,cw->dhwabc", Pd, Ph, Pw)
    return P.reshape(D * H * W, out[0] * out[1] * out[2])   # (DHW, 18), float64


# ------------------------------- fused kernel ------------------------------------
def _fused_kernel(x_ref, r_ref, pt_ref, w1_ref, b1_ref, w2a_ref, w2b_ref, b2_ref,
                  o_ref, h_acc):
    # x_ref  : (CC, B, DHW)   bf16  -- this grid step's channel chunk (streamed)
    # r_ref  : (B, R)         bf16  -- radiomics feats (zero dummy if none)
    # pt_ref : (DHW, 18)      bf16  -- adaptive-avg-pool matrix
    # w1_ref : (CC, 18, 128)  bf16  -- fc1 weight slice for this chunk
    # b1_ref : (1, 128)       f32
    # w2a_ref: (128, class)   bf16  -- fc2 weight for the h part
    # w2b_ref: (R, class)     bf16  -- fc2 weight for the radiomics part
    # b2_ref : (1, class)     f32
    # o_ref  : (B, class)     f32
    # h_acc  : (B, 128)       f32   -- VMEM scratch, resident across grid steps
    ci = pl.program_id(0)

    @pl.when(ci == 0)
    def _():
        # Fold the fc1 bias into the accumulator init (no extra epilogue pass).
        h_acc[...] = jnp.broadcast_to(b1_ref[...], h_acc.shape)

    h = h_acc[...]
    cc = x_ref.shape[0]
    for c in range(cc):                               # static unroll, cc is small
        # AdaptiveAvgPool3d for one channel: (B, DHW) @ (DHW, 18) -> f32
        pooled = jnp.dot(x_ref[c], pt_ref[...],
                         preferred_element_type=jnp.float32)
        # fc1 contribution of this channel: (B, 18) @ (18, 128) -> f32
        h = h + jnp.dot(pooled.astype(jnp.bfloat16), w1_ref[c],
                        preferred_element_type=jnp.float32)
    h_acc[...] = h

    @pl.when(ci == pl.num_programs(0) - 1)
    def _():
        # fc2 over concat([h, radiomics]) == h @ W2a + r @ W2b + b2
        out = jnp.dot(h.astype(jnp.bfloat16), w2a_ref[...],
                      preferred_element_type=jnp.float32)
        out = out + jnp.dot(r_ref[...], w2b_ref[...],
                            preferred_element_type=jnp.float32)
        o_ref[...] = out + b2_ref[...]


@partial(jax.jit, static_argnames=("cc",))
def _forward(x_cbd, r, pt, w1, b1, w2a, w2b, b2, *, cc):
    # NOTE: retraces per distinct (B, C, DHW, R, class_num) — expected for
    # variable-shape inference.
    C, B, DHW = x_cbd.shape
    R = r.shape[1]
    class_num = b2.shape[1]
    grid = (C // cc,)
    return pl.pallas_call(
        _fused_kernel,
        out_shape=jax.ShapeDtypeStruct((B, class_num), jnp.float32),
        grid_spec=pltpu.PrefetchScalarGridSpec(
            num_scalar_prefetch=0,
            grid=grid,
            in_specs=[
                pl.BlockSpec((cc, B, DHW), lambda ci: (ci, 0, 0)),    # x chunk
                pl.BlockSpec((B, R), lambda ci: (0, 0)),              # radiomics
                pl.BlockSpec((DHW, 18), lambda ci: (0, 0)),           # pool matrix
                pl.BlockSpec((cc, 18, 128), lambda ci: (ci, 0, 0)),   # w1 chunk
                pl.BlockSpec((1, 128), lambda ci: (0, 0)),            # b1
                pl.BlockSpec((128, class_num), lambda ci: (0, 0)),    # w2a
                pl.BlockSpec((R, class_num), lambda ci: (0, 0)),      # w2b
                pl.BlockSpec((1, class_num), lambda ci: (0, 0)),      # b2
            ],
            out_specs=pl.BlockSpec((B, class_num), lambda ci: (0, 0)),
            scratch_shapes=[pltpu.VMEM((B, 128), jnp.float32)],
        ),
        compiler_params=pltpu.CompilerParams(
            # channel-chunk axis is a reduction (accumulator), so "arbitrary".
            dimension_semantics=("arbitrary",)),
    )(x_cbd, r, pt, w1, b1, w2a, w2b, b2)


# ------------------------------- model wrapper -----------------------------------
class MyClassiferPallas:
    def __init__(self, n_filters: int, n_radiomics: int, class_num: int, key):
        self.n_filters = n_filters
        self.n_radiomics = n_radiomics
        self.class_num = class_num
        C = 8 * n_filters
        self.C = C

        k1, k2, k3, k4 = jax.random.split(key, 4)
        fan1 = 18 * C
        bound1 = 1.0 / np.sqrt(fan1)
        # nn.Linear stores weight as (out_features, in_features)
        self.w1 = jax.random.uniform(k1, (128, fan1), jnp.float32, -bound1, bound1)
        self.b1 = jax.random.uniform(k2, (128,), jnp.float32, -bound1, bound1)
        fan2 = 128 + n_radiomics
        bound2 = 1.0 / np.sqrt(fan2)
        self.w2 = jax.random.uniform(k3, (class_num, fan2), jnp.float32, -bound2, bound2)
        self.b2 = jax.random.uniform(k4, (class_num,), jnp.float32, -bound2, bound2)

        # ---- hoisted, kernel-ready layouts: bf16 matmul operands, f32 biases ----
        w1_np = np.asarray(self.w1)                                  # (128, C*18)
        # w1_k[c, o, n] = w1[n, c*18 + o]  (matches torch Flatten ordering)
        self.w1_k = jnp.asarray(w1_np.T.reshape(C, 18, 128), dtype=jnp.bfloat16)
        self.b1_k = jnp.asarray(self.b1).reshape(1, 128).astype(jnp.float32)

        w2_np = np.asarray(self.w2)
        self.w2a_k = jnp.asarray(w2_np[:, :128].T, dtype=jnp.bfloat16)   # (128, cls)
        if n_radiomics > 0:
            self.n_rad_eff = n_radiomics
            self.w2b_k = jnp.asarray(w2_np[:, 128:].T, dtype=jnp.bfloat16)
        else:
            # zero dummy block: same kernel, contributes exactly 0
            self.n_rad_eff = 8
            self.w2b_k = jnp.zeros((self.n_rad_eff, class_num), dtype=jnp.bfloat16)
        self.b2_k = jnp.asarray(self.b2).reshape(1, class_num).astype(jnp.float32)

        self._pt_cache = {}      # (D, H, W) -> (DHW, 18) bf16 pool matrix (tiny)

    def _pt(self, D: int, H: int, W: int):
        key = (D, H, W)
        if key not in self._pt_cache:
            self._pt_cache[key] = jnp.asarray(_pool3d_matrix(D, H, W),
                                              dtype=jnp.bfloat16)
        return self._pt_cache[key]

    def __call__(self, x, radiomics_feats=None):
        B, C, D, H, W = x.shape
        assert C == self.C, "channels must equal 8 * n_filters"
        # Larger B is supported as-is (all per-step buffers scale only with
        # B*cc*DHW); for very large B add a "parallel" batch grid axis (2 TCs
        # on v7x).  Batching more rows per call amortizes launch + weight DMA.
        # TODO(synk): in a real pipeline the upstream conv should emit this
        # channel-major bf16 layout directly instead of casting here.
        x_cbd = jnp.transpose(x, (1, 0, 2, 3, 4)).reshape(C, B, D * H * W)
        x_cbd = x_cbd.astype(jnp.bfloat16)
        if self.n_radiomics > 0:
            r = radiomics_feats.astype(jnp.bfloat16)
        else:
            r = jnp.zeros((B, self.n_rad_eff), dtype=jnp.bfloat16)
        cc = 8                              # C = 8*n_filters, so cc always divides C
        return _forward(x_cbd, r, self._pt(D, H, W), self.w1_k, self.b1_k,
                        self.w2a_k, self.w2b_k, self.b2_k, cc=cc)


# ------------------------------ numpy reference (float64) ------------------------
def reference_forward(model: MyClassiferPallas, x, radiomics_feats):
    xn = np.asarray(x, dtype=np.float64)
    B, C, D, H, W = xn.shape

    def rng(o, insz, outsz):
        s = (o * insz) // outsz
        e = -((-(o + 1) * insz) // outsz)
        return s, e

    pooled = np.zeros((B, C, 2, 3, 3), np.float64)
    for od in range(2):
        ds, de = rng(od, D, 2)
        for oh in range(3):
            hs, he = rng(oh, H, 3)
            for ow in range(3):
                ws, we = rng(ow, W, 3)
                pooled[:, :, od, oh, ow] = xn[:, :, ds:de, hs:he, ws:we].mean(axis=(2, 3, 4))

    z = pooled.reshape(B, C * 18)
    h = z @ np.asarray(model.w1, dtype=np.float64).T + np.asarray(model.b1, dtype=np.float64)
    if model.n_radiomics != 0:
        cat = np.concatenate([h, np.asarray(radiomics_feats, dtype=np.float64)], axis=1)
    else:
        cat = h
    return cat @ np.asarray(model.w2, dtype=np.float64).T + np.asarray(model.b2, dtype=np.float64)


# ------------------------------------ main ----------------------------------------
if __name__ == "__main__":
    n_filters, n_radiomics, class_num = 4, 8, 3
    B, C, D, H, W = 2, 8 * n_filters, 5, 7, 7   # non-divisible D/H/W exercise adaptive pooling

    key = jax.random.PRNGKey(0)
    k_model, k_model0, k_x, k_r = jax.random.split(key, 4)

    x = jax.random.normal(k_x, (B, C, D, H, W), dtype=jnp.float32)
    radiomics = jax.random.normal(k_r, (B, n_radiomics), dtype=jnp.float32)

    # --- branch with radiomics features ---
    model = MyClassiferPallas(n_filters, n_radiomics, class_num, k_model)
    out = jax.block_until_ready(model(x, radiomics))
    ref = reference_forward(model, x, radiomics)
    # bf16 matmul operands with f32 accumulation -> ~1e-3 abs error, use 2e-2 tol
    np.testing.assert_allclose(np.asarray(out), ref, rtol=2e-2, atol=2e-2)

    # --- branch without radiomics features (n_radiomics == 0) ---
    model0 = MyClassiferPallas(n_filters, 0, class_num, k_model0)
    out0 = jax.block_until_ready(model0(x, None))
    ref0 = reference_forward(model0, x, None)
    np.testing.assert_allclose(np.asarray(out0), ref0, rtol=2e-2, atol=2e-2)

    print("KERNEL_OK")
</pallas_src>

<mosaic_0001>
module attributes {stable_mosaic.version = 11 : i64} {
  func.func @_fused_kernel(%arg0: i32, %arg1: memref<8x2x245xbf16, #tpu.memory_space<vmem>>, %arg2: memref<2x8xbf16, #tpu.memory_space<vmem>>, %arg3: memref<245x18xbf16, #tpu.memory_space<vmem>>, %arg4: memref<8x18x128xbf16, #tpu.memory_space<vmem>>, %arg5: memref<1x128xf32, #tpu.memory_space<vmem>>, %arg6: memref<128x3xbf16, #tpu.memory_space<vmem>>, %arg7: memref<8x3xbf16, #tpu.memory_space<vmem>>, %arg8: memref<1x3xf32, #tpu.memory_space<vmem>>, %arg9: memref<2x3xf32, #tpu.memory_space<vmem>>, %arg10: memref<2x128xf32, #tpu.memory_space<vmem>>) attributes {dimension_semantics = [#tpu.dimension_semantics<arbitrary>], iteration_bounds = array<i64: 4>, scalar_prefetch = 0 : i64, scratch_operands = 1 : i64, tpu.core_type = #tpu.core_type<tc>, window_params = [{transform_indices = @transform_0, window_bounds = array<i64: 8, 2, 245>}, {pipeline_mode = #tpu.pipeline_mode<synchronous>, transform_indices = @transform_1, window_bounds = array<i64: 2, 8>}, {pipeline_mode = #tpu.pipeline_mode<synchronous>, transform_indices = @transform_2, window_bounds = array<i64: 245, 18>}, {transform_indices = @transform_3, window_bounds = array<i64: 8, 18, 128>}, {pipeline_mode = #tpu.pipeline_mode<synchronous>, transform_indices = @transform_4, window_bounds = array<i64: 1, 128>}, {pipeline_mode = #tpu.pipeline_mode<synchronous>, transform_indices = @transform_5, window_bounds = array<i64: 128, 3>}, {pipeline_mode = #tpu.pipeline_mode<synchronous>, transform_indices = @transform_6, window_bounds = array<i64: 8, 3>}, {pipeline_mode = #tpu.pipeline_mode<synchronous>, transform_indices = @transform_7, window_bounds = array<i64: 1, 3>}, {pipeline_mode = #tpu.pipeline_mode<synchronous>, transform_indices = @transform_8, window_bounds = array<i64: 2, 3>}]} {
    %c0_i32 = arith.constant 0 : i32
    %0 = arith.cmpi eq, %arg0, %c0_i32 : i32
    %1 = arith.extui %0 : i1 to i32
    %c0_i32_0 = arith.constant 0 : i32
    %2 = arith.cmpi ne, %1, %c0_i32_0 : i32
    scf.if %2 {
      %c0_77 = arith.constant 0 : index
      %c0_78 = arith.constant 0 : index
      %80 = vector.load %arg5[%c0_77, %c0_78] : memref<1x128xf32, #tpu.memory_space<vmem>>, vector<1x128xf32>
      %81 = vector.shape_cast %80 : vector<1x128xf32> to vector<1x128xf32>
      %82 = vector.broadcast %81 : vector<1x128xf32> to vector<2x128xf32>
      %c0_79 = arith.constant 0 : index
      %c0_80 = arith.constant 0 : index
      %83 = vector.load %arg10[%c0_79, %c0_80] : memref<2x128xf32, #tpu.memory_space<vmem>>, vector<2x128xf32>
      tpu.vector_store %arg10[%c0_79, %c0_80], %82 {strides = array<i32>} : memref<2x128xf32, #tpu.memory_space<vmem>>, vector<2x128xf32>,
    } else {
    }
    %c0 = arith.constant 0 : index
    %c0_1 = arith.constant 0 : index
    %3 = vector.load %arg10[%c0, %c0_1] : memref<2x128xf32, #tpu.memory_space<vmem>>, vector<2x128xf32>
    %c0_2 = arith.constant 0 : index
    %c0_3 = arith.constant 0 : index
    %c0_4 = arith.constant 0 : index
    %4 = vector.load %arg1[%c0_2, %c0_3, %c0_4] : memref<8x2x245xbf16, #tpu.memory_space<vmem>>, vector<1x2x245xbf16>
    %5 = vector.shape_cast %4 : vector<1x2x245xbf16> to vector<2x245xbf16>
    %c0_5 = arith.constant 0 : index
    %c0_6 = arith.constant 0 : index
    %6 = vector.load %arg3[%c0_5, %c0_6] : memref<245x18xbf16, #tpu.memory_space<vmem>>, vector<245x18xbf16>
    %cst = arith.constant dense<0.000000e+00> : vector<2x18xf32>
    %7 = tpu.matmul %5, %6, %cst {dimension_numbers = #tpu.dot_dimension_numbers<[1], [0], [0], [1], [0, 0, 1, 1], [], []>} : vector<2x245xbf16>, vector<245x18xbf16>, vector<2x18xf32> -> vector<2x18xf32>
    %8 = arith.truncf %7 : vector<2x18xf32> to vector<2x18xbf16>
    %c0_7 = arith.constant 0 : index
    %c0_8 = arith.constant 0 : index
    %c0_9 = arith.constant 0 : index
    %9 = vector.load %arg4[%c0_7, %c0_8, %c0_9] : memref<8x18x128xbf16, #tpu.memory_space<vmem>>, vector<1x18x128xbf16>
    %10 = vector.shape_cast %9 : vector<1x18x128xbf16> to vector<18x128xbf16>
    %cst_10 = arith.constant dense<0.000000e+00> : vector<2x128xf32>
    %11 = tpu.matmul %8, %10, %cst_10 {dimension_numbers = #tpu.dot_dimension_numbers<[1], [0], [0], [1], [0, 0, 1, 1], [], []>} : vector<2x18xbf16>, vector<18x128xbf16>, vector<2x128xf32> -> vector<2x128xf32>
    %12 = arith.addf %3, %11 : vector<2x128xf32>
    %c1 = arith.constant 1 : index
    %c0_11 = arith.constant 0 : index
    %c0_12 = arith.constant 0 : index
    %13 = vector.load %arg1[%c1, %c0_11, %c0_12] : memref<8x2x245xbf16, #tpu.memory_space<vmem>>, vector<1x2x245xbf16>
    %14 = vector.shape_cast %13 : vector<1x2x245xbf16> to vector<2x245xbf16>
    %c0_13 = arith.constant 0 : index
    %c0_14 = arith.constant 0 : index
    %15 = vector.load %arg3[%c0_13, %c0_14] : memref<245x18xbf16, #tpu.memory_space<vmem>>, vector<245x18xbf16>
    %cst_15 = arith.constant dense<0.000000e+00> : vector<2x18xf32>
    %16 = tpu.matmul %14, %15, %cst_15 {dimension_numbers = #tpu.dot_dimension_numbers<[1], [0], [0], [1], [0, 0, 1, 1], [], []>} : vector<2x245xbf16>, vector<245x18xbf16>, vector<2x18xf32> -> vector<2x18xf32>
    %17 = arith.truncf %16 : vector<2x18xf32> to vector<2x18xbf16>
    %c1_16 = arith.constant 1 : index
    %c0_17 = arith.constant 0 : index
    %c0_18 = arith.constant 0 : index
    %18 = vector.load %arg4[%c1_16, %c0_17, %c0_18] : memref<8x18x128xbf16, #tpu.memory_space<vmem>>, vector<1x18x128xbf16>
    %19 = vector.shape_cast %18 : vector<1x18x128xbf16> to vector<18x128xbf16>
    %cst_19 = arith.constant dense<0.000000e+00> : vector<2x128xf32>
    %20 = tpu.matmul %17, %19, %cst_19 {dimension_numbers = #tpu.dot_dimension_numbers<[1], [0], [0], [1], [0, 0, 1, 1], [], []>} : vector<2x18xbf16>, vector<18x128xbf16>, vector<2x128xf32> -> vector<2x128xf32>
    %21 = arith.addf %12, %20 : vector<2x128xf32>
    %c2 = arith.constant 2 : index
    %c0_20 = arith.constant 0 : index
    %c0_21 = arith.constant 0 : index
    %22 = vector.load %arg1[%c2, %c0_20, %c0_21] : memref<8x2x245xbf16, #tpu.memory_space<vmem>>, vector<1x2x245xbf16>
    %23 = vector.shape_cast %22 : vector<1x2x245xbf16> to vector<2x245xbf16>
    %c0_22 = arith.constant 0 : index
    %c0_23 = arith.constant 0 : index
    %24 = vector.load %arg3[%c0_22, %c0_23] : memref<245x18xbf16, #tpu.memory_space<vmem>>, vector<245x18xbf16>
    %cst_24 = arith.constant dense<0.000000e+00> : vector<2x18xf32>
    %25 = tpu.matmul %23, %24, %cst_24 {dimension_numbers = #tpu.dot_dimension_numbers<[1], [0], [0], [1], [0, 0, 1, 1], [], []>} : vector<2x245xbf16>, vector<245x18xbf16>, vector<2x18xf32> -> vector<2x18xf32>
    %26 = arith.truncf %25 : vector<2x18xf32> to vector<2x18xbf16>
    %c2_25 = arith.constant 2 : index
    %c0_26 = arith.constant 0 : index
    %c0_27 = arith.constant 0 : index
    %27 = vector.load %arg4[%c2_25, %c0_26, %c0_27] : memref<8x18x128xbf16, #tpu.memory_space<vmem>>, vector<1x18x128xbf16>
    %28 = vector.shape_cast %27 : vector<1x18x128xbf16> to vector<18x128xbf16>
    %cst_28 = arith.constant dense<0.000000e+00> : vector<2x128xf32>
    %29 = tpu.matmul %26, %28, %cst_28 {dimension_numbers = #tpu.dot_dimension_numbers<[1], [0], [0], [1], [0, 0, 1, 1], [], []>} : vector<2x18xbf16>, vector<18x128xbf16>, vector<2x128xf32> -> vector<2x128xf32>
    %30 = arith.addf %21, %29 : vector<2x128xf32>
    %c3 = arith.constant 3 : index
    %c0_29 = arith.constant 0 : index
    %c0_30 = arith.constant 0 : index
    %31 = vector.load %arg1[%c3, %c0_29, %c0_30] : memref<8x2x245xbf16, #tpu.memory_space<vmem>>, vector<1x2x245xbf16>
    %32 = vector.shape_cast %31 : vector<1x2x245xbf16> to vector<2x245xbf16>
    %c0_31 = arith.constant 0 : index
    %c0_32 = arith.constant 0 : index
    %33 = vector.load %arg3[%c0_31, %c0_32] : memref<245x18xbf16, #tpu.memory_space<vmem>>, vector<245x18xbf16>
    %cst_33 = arith.constant dense<0.000000e+00> : vector<2x18xf32>
    %34 = tpu.matmul %32, %33, %cst_33 {dimension_numbers = #tpu.dot_dimension_numbers<[1], [0], [0], [1], [0, 0, 1, 1], [], []>} : vector<2x245xbf16>, vector<245x18xbf16>, vector<2x18xf32> -> vector<2x18xf32>
    %35 = arith.truncf %34 : vector<2x18xf32> to vector<2x18xbf16>
    %c3_34 = arith.constant 3 : index
    %c0_35 = arith.constant 0 : index
    %c0_36 = arith.constant 0 : index
    %36 = vector.load %arg4[%c3_34, %c0_35, %c0_36] : memref<8x18x128xbf16, #tpu.memory_space<vmem>>, vector<1x18x128xbf16>
    %37 = vector.shape_cast %36 : vector<1x18x128xbf16> to vector<18x128xbf16>
    %cst_37 = arith.constant dense<0.000000e+00> : vector<2x128xf32>
    %38 = tpu.matmul %35, %37, %cst_37 {dimension_numbers = #tpu.dot_dimension_numbers<[1], [0], [0], [1], [0, 0, 1, 1], [], []>} : vector<2x18xbf16>, vector<18x128xbf16>, vector<2x128xf32> -> vector<2x128xf32>
    %39 = arith.addf %30, %38 : vector<2x128xf32>
    %c4 = arith.constant 4 : index
    %c0_38 = arith.constant 0 : index
    %c0_39 = arith.constant 0 : index
    %40 = vector.load %arg1[%c4, %c0_38, %c0_39] : memref<8x2x245xbf16, #tpu.memory_space<vmem>>, vector<1x2x245xbf16>
    %41 = vector.shape_cast %40 : vector<1x2x245xbf16> to vector<2x245xbf16>
    %c0_40 = arith.constant 0 : index
    %c0_41 = arith.constant 0 : index
    %42 = vector.load %arg3[%c0_40, %c0_41] : memref<245x18xbf16, #tpu.memory_space<vmem>>, vector<245x18xbf16>
    %cst_42 = arith.constant dense<0.000000e+00> : vector<2x18xf32>
    %43 = tpu.matmul %41, %42, %cst_42 {dimension_numbers = #tpu.dot_dimension_numbers<[1], [0], [0], [1], [0, 0, 1, 1], [], []>} : vector<2x245xbf16>, vector<245x18xbf16>, vector<2x18xf32> -> vector<2x18xf32>
    %44 = arith.truncf %43 : vector<2x18xf32> to vector<2x18xbf16>
    %c4_43 = arith.constant 4 : index
    %c0_44 = arith.constant 0 : index
    %c0_45 = arith.constant 0 : index
    %45 = vector.load %arg4[%c4_43, %c0_44, %c0_45] : memref<8x18x128xbf16, #tpu.memory_space<vmem>>, vector<1x18x128xbf16>
    %46 = vector.shape_cast %45 : vector<1x18x128xbf16> to vector<18x128xbf16>
    %cst_46 = arith.constant dense<0.000000e+00> : vector<2x128xf32>
    %47 = tpu.matmul %44, %46, %cst_46 {dimension_numbers = #tpu.dot_dimension_numbers<[1], [0], [0], [1], [0, 0, 1, 1], [], []>} : vector<2x18xbf16>, vector<18x128xbf16>, vector<2x128xf32> -> vector<2x128xf32>
    %48 = arith.addf %39, %47 : vector<2x128xf32>
    %c5 = arith.constant 5 : index
    %c0_47 = arith.constant 0 : index
    %c0_48 = arith.constant 0 : index
    %49 = vector.load %arg1[%c5, %c0_47, %c0_48] : memref<8x2x245xbf16, #tpu.memory_space<vmem>>, vector<1x2x245xbf16>
    %50 = vector.shape_cast %49 : vector<1x2x245xbf16> to vector<2x245xbf16>
    %c0_49 = arith.constant 0 : index
    %c0_50 = arith.constant 0 : index
    %51 = vector.load %arg3[%c0_49, %c0_50] : memref<245x18xbf16, #tpu.memory_space<vmem>>, vector<245x18xbf16>
    %cst_51 = arith.constant dense<0.000000e+00> : vector<2x18xf32>
    %52 = tpu.matmul %50, %51, %cst_51 {dimension_numbers = #tpu.dot_dimension_numbers<[1], [0], [0], [1], [0, 0, 1, 1], [], []>} : vector<2x245xbf16>, vector<245x18xbf16>, vector<2x18xf32> -> vector<2x18xf32>
    %53 = arith.truncf %52 : vector<2x18xf32> to vector<2x18xbf16>
    %c5_52 = arith.constant 5 : index
    %c0_53 = arith.constant 0 : index
    %c0_54 = arith.constant 0 : index
    %54 = vector.load %arg4[%c5_52, %c0_53, %c0_54] : memref<8x18x128xbf16, #tpu.memory_space<vmem>>, vector<1x18x128xbf16>
    %55 = vector.shape_cast %54 : vector<1x18x128xbf16> to vector<18x128xbf16>
    %cst_55 = arith.constant dense<0.000000e+00> : vector<2x128xf32>
    %56 = tpu.matmul %53, %55, %cst_55 {dimension_numbers = #tpu.dot_dimension_numbers<[1], [0], [0], [1], [0, 0, 1, 1], [], []>} : vector<2x18xbf16>, vector<18x128xbf16>, vector<2x128xf32> -> vector<2x128xf32>
    %57 = arith.addf %48, %56 : vector<2x128xf32>
    %c6 = arith.constant 6 : index
    %c0_56 = arith.constant 0 : index
    %c0_57 = arith.constant 0 : index
    %58 = vector.load %arg1[%c6, %c0_56, %c0_57] : memref<8x2x245xbf16, #tpu.memory_space<vmem>>, vector<1x2x245xbf16>
    %59 = vector.shape_cast %58 : vector<1x2x245xbf16> to vector<2x245xbf16>
    %c0_58 = arith.constant 0 : index
    %c0_59 = arith.constant 0 : index
    %60 = vector.load %arg3[%c0_58, %c0_59] : memref<245x18xbf16, #tpu.memory_space<vmem>>, vector<245x18xbf16>
    %cst_60 = arith.constant dense<0.000000e+00> : vector<2x18xf32>
    %61 = tpu.matmul %59, %60, %cst_60 {dimension_numbers = #tpu.dot_dimension_numbers<[1], [0], [0], [1], [0, 0, 1, 1], [], []>} : vector<2x245xbf16>, vector<245x18xbf16>, vector<2x18xf32> -> vector<2x18xf32>
    %62 = arith.truncf %61 : vector<2x18xf32> to vector<2x18xbf16>
    %c6_61 = arith.constant 6 : index
    %c0_62 = arith.constant 0 : index
    %c0_63 = arith.constant 0 : index
    %63 = vector.load %arg4[%c6_61, %c0_62, %c0_63] : memref<8x18x128xbf16, #tpu.memory_space<vmem>>, vector<1x18x128xbf16>
    %64 = vector.shape_cast %63 : vector<1x18x128xbf16> to vector<18x128xbf16>
    %cst_64 = arith.constant dense<0.000000e+00> : vector<2x128xf32>
    %65 = tpu.matmul %62, %64, %cst_64 {dimension_numbers = #tpu.dot_dimension_numbers<[1], [0], [0], [1], [0, 0, 1, 1], [], []>} : vector<2x18xbf16>, vector<18x128xbf16>, vector<2x128xf32> -> vector<2x128xf32>
    %66 = arith.addf %57, %65 : vector<2x128xf32>
    %c7 = arith.constant 7 : index
    %c0_65 = arith.constant 0 : index
    %c0_66 = arith.constant 0 : index
    %67 = vector.load %arg1[%c7, %c0_65, %c0_66] : memref<8x2x245xbf16, #tpu.memory_space<vmem>>, vector<1x2x245xbf16>
    %68 = vector.shape_cast %67 : vector<1x2x245xbf16> to vector<2x245xbf16>
    %c0_67 = arith.constant 0 : index
    %c0_68 = arith.constant 0 : index
    %69 = vector.load %arg3[%c0_67, %c0_68] : memref<245x18xbf16, #tpu.memory_space<vmem>>, vector<245x18xbf16>
    %cst_69 = arith.constant dense<0.000000e+00> : vector<2x18xf32>
    %70 = tpu.matmul %68, %69, %cst_69 {dimension_numbers = #tpu.dot_dimension_numbers<[1], [0], [0], [1], [0, 0, 1, 1], [], []>} : vector<2x245xbf16>, vector<245x18xbf16>, vector<2x18xf32> -> vector<2x18xf32>
    %71 = arith.truncf %70 : vector<2x18xf32> to vector<2x18xbf16>
    %c7_70 = arith.constant 7 : index
    %c0_71 = arith.constant 0 : index
    %c0_72 = arith.constant 0 : index
    %72 = vector.load %arg4[%c7_70, %c0_71, %c0_72] : memref<8x18x128xbf16, #tpu.memory_space<vmem>>, vector<1x18x128xbf16>
    %73 = vector.shape_cast %72 : vector<1x18x128xbf16> to vector<18x128xbf16>
    %cst_73 = arith.constant dense<0.000000e+00> : vector<2x128xf32>
    %74 = tpu.matmul %71, %73, %cst_73 {dimension_numbers = #tpu.dot_dimension_numbers<[1], [0], [0], [1], [0, 0, 1, 1], [], []>} : vector<2x18xbf16>, vector<18x128xbf16>, vector<2x128xf32> -> vector<2x128xf32>
    %75 = arith.addf %66, %74 : vector<2x128xf32>
    %c0_74 = arith.constant 0 : index
    %c0_75 = arith.constant 0 : index
    %76 = vector.load %arg10[%c0_74, %c0_75] : memref<2x128xf32, #tpu.memory_space<vmem>>, vector<2x128xf32>
    tpu.vector_store %arg10[%c0_74, %c0_75], %75 {strides = array<i32>} : memref<2x128xf32, #tpu.memory_space<vmem>>, vector<2x128xf32>,
    %c3_i32 = arith.constant 3 : i32
    %77 = arith.cmpi eq, %arg0, %c3_i32 : i32
    %78 = arith.extui %77 : i1 to i32
    %c0_i32_76 = arith.constant 0 : i32
    %79 = arith.cmpi ne, %78, %c0_i32_76 : i32
    scf.if %79 {
      %80 = arith.truncf %75 : vector<2x128xf32> to vector<2x128xbf16>
      %c0_77 = arith.constant 0 : index
      %c0_78 = arith.constant 0 : index
      %81 = vector.load %arg6[%c0_77, %c0_78] : memref<128x3xbf16, #tpu.memory_space<vmem>>, vector<128x3xbf16>
      %cst_79 = arith.constant dense<0.000000e+00> : vector<2x3xf32>
      %82 = tpu.matmul %80, %81, %cst_79 {dimension_numbers = #tpu.dot_dimension_numbers<[1], [0], [0], [1], [0, 0, 1, 1], [], []>} : vector<2x128xbf16>, vector<128x3xbf16>, vector<2x3xf32> -> vector<2x3xf32>
      %c0_80 = arith.constant 0 : index
      %c0_81 = arith.constant 0 : index
      %83 = vector.load %arg2[%c0_80, %c0_81] : memref<2x8xbf16, #tpu.memory_space<vmem>>, vector<2x8xbf16>
      %c0_82 = arith.constant 0 : index
      %c0_83 = arith.constant 0 : index
      %84 = vector.load %arg7[%c0_82, %c0_83] : memref<8x3xbf16, #tpu.memory_space<vmem>>, vector<8x3xbf16>
      %cst_84 = arith.constant dense<0.000000e+00> : vector<2x3xf32>
      %85 = tpu.matmul %83, %84, %cst_84 {dimension_numbers = #tpu.dot_dimension_numbers<[1], [0], [0], [1], [0, 0, 1, 1], [], []>} : vector<2x8xbf16>, vector<8x3xbf16>, vector<2x3xf32> -> vector<2x3xf32>
      %86 = arith.addf %82, %85 : vector<2x3xf32>
      %c0_85 = arith.constant 0 : index
      %c0_86 = arith.constant 0 : index
      %87 = vector.load %arg8[%c0_85, %c0_86] : memref<1x3xf32, #tpu.memory_space<vmem>>, vector<1x3xf32>
      %88 = vector.broadcast %87 : vector<1x3xf32> to vector<2x3xf32>
      %89 = arith.addf %86, %88 : vector<2x3xf32>
      %c0_87 = arith.constant 0 : index
      %c0_88 = arith.constant 0 : index
      %90 = vector.load %arg9[%c0_87, %c0_88] : memref<2x3xf32, #tpu.memory_space<vmem>>, vector<2x3xf32>
      tpu.vector_store %arg9[%c0_87, %c0_88], %89 {strides = array<i32>} : memref<2x3xf32, #tpu.memory_space<vmem>>, vector<2x3xf32>,
    } else {
    }
    return
  }
  func.func @transform_0(%arg0: i32) -> (i32, i32, i32) {
    %c0_i32 = arith.constant 0 : i32
    %c0_i32_0 = arith.constant 0 : i32
    %c0_i32_1 = arith.constant 0 : i32
    return %arg0, %c0_i32, %c0_i32_0 : i32, i32, i32
  }
  func.func @transform_1(%arg0: i32) -> (i32, i32) {
    %c0_i32 = arith.constant 0 : i32
    %c0_i32_0 = arith.constant 0 : i32
    %c0_i32_1 = arith.constant 0 : i32
    return %c0_i32, %c0_i32_0 : i32, i32
  }
  func.func @transform_2(%arg0: i32) -> (i32, i32) {
    %c0_i32 = arith.constant 0 : i32
    %c0_i32_0 = arith.constant 0 : i32
    %c0_i32_1 = arith.constant 0 : i32
    return %c0_i32, %c0_i32_0 : i32, i32
  }
  func.func @transform_3(%arg0: i32) -> (i32, i32, i32) {
    %c0_i32 = arith.constant 0 : i32
    %c0_i32_0 = arith.constant 0 : i32
    %c0_i32_1 = arith.constant 0 : i32
    return %arg0, %c0_i32, %c0_i32_0 : i32, i32, i32
  }
  func.func @transform_4(%arg0: i32) -> (i32, i32) {
    %c0_i32 = arith.constant 0 : i32
    %c0_i32_0 = arith.constant 0 : i32
    %c0_i32_1 = arith.constant 0 : i32
    return %c0_i32, %c0_i32_0 : i32, i32
  }
  func.func @transform_5(%arg0: i32) -> (i32, i32) {
    %c0_i32 = arith.constant 0 : i32
    %c0_i32_0 = arith.constant 0 : i32
    %c0_i32_1 = arith.constant 0 : i32
    return %c0_i32, %c0_i32_0 : i32, i32
  }
  func.func @transform_6(%arg0: i32) -> (i32, i32) {
    %c0_i32 = arith.constant 0 : i32
    %c0_i32_0 = arith.constant 0 : i32
    %c0_i32_1 = arith.constant 0 : i32
    return %c0_i32, %c0_i32_0 : i32, i32
  }
  func.func @transform_7(%arg0: i32) -> (i32, i32) {
    %c0_i32 = arith.constant 0 : i32
    %c0_i32_0 = arith.constant 0 : i32
    %c0_i32_1 = arith.constant 0 : i32
    return %c0_i32, %c0_i32_0 : i32, i32
  }
  func.func @transform_8(%arg0: i32) -> (i32, i32) {
    %c0_i32 = arith.constant 0 : i32
    %c0_i32_0 = arith.constant 0 : i32
    %c0_i32_1 = arith.constant 0 : i32
    return %c0_i32, %c0_i32_0 : i32, i32
  }
}

</mosaic_0001>

<bundles_post_ra>
// kernel: _forward.1
= control target key start
LH: loop header
LB: loop body
LE: loop exit
PB: predicated region body
PF: predicated region fallthrough
CT: control target
= control target key end

     0   :  { %13 = vsyncpa [#allocation4], 0  ;;  %s2324_s27 = smov 0   ;;  %s2719_s0 = inlined_call_operand.vmem [shape: bf16[32,2,245], index: 0, kind: input, shape index: {}]   ;;  %s2720_s1 = inlined_call_operand.vmem [shape: bf16[2,8], index: 1, kind: input, shape index: {}]   ;;  %s2721_s2 = inlined_call_operand.vmem [shape: bf16[245,18], index: 2, kind: input, shape index: {}]   ;;  %s2722_s3 = inlined_call_operand.vmem [shape: bf16[32,18,128], index: 3, kind: input, shape index: {}]   ;;  %s2723_s4 = inlined_call_operand.vmem [shape: f32[1,128], index: 4, kind: input, shape index: {}]   ;;  %s2724_s5 = inlined_call_operand.vmem [shape: bf16[128,3], index: 5, kind: input, shape index: {}]   ;;  %s2725_s6 = inlined_call_operand.vmem [shape: bf16[8,3], index: 6, kind: input, shape index: {}]   ;;  %s2726_s7 = inlined_call_operand.vmem [shape: f32[1,3], index: 7, kind: input, shape index: {}]   ;;  %s2727_s8 = inlined_call_operand.hbm [shape: f32[2,3], index: 8, kind: output, shape index: {}]  }
   0x1 LB: > { %s2330_s28 = sadd.s32 4294967295, %s2270_s27   ;;  %p1736_p0 = scmp.ge.s32.totalorder %s2270_s27, 1  ;;  %s2270_s27 = sphi %s2324_s27, %s19_s27  }
   0x2   : > { %p271_p1 = scmp.lt.s32.totalorder %s2270_s27, 5 }
   0x4   : > { %p272_p2 = pnand %p1736_p0, %p271_p1 }
   0x5   : > { %s1737_s29 = sshll.u32 (!%p272_p2), %s2330_s28, 3  ;;  %p1741_p4 = scmp.ne.s32.totalorder (!%p272_p2), %s2330_s28, 0 }
   0x6   : > { %275 = sbr.rel (%p272_p2) target bundleno = 1523 (0x5f3), region = 52  ;;  %p307_p3 = scmp.lt.s32.totalorder (!%p272_p2), %s1737_s29, 31 }
   0xd   : > { %s2729_s29 = smov (!%p307_p3, %s1737_s29), 31  ;;  %323 = sbr.rel (%p1741_p4) target bundleno = 20 (0x14), region = 56 }
   0xe   : > { %s1738_s30 = sshll.u32 %s2729_s29, 1  ;;  %s2172_s9 = smul.u32 12, %s2729_s29  ;;  %v1742_v0 = vld [vmem:[%s2723_s4] ss:$0 sm:$0xff] (!%p1741_p4) }
   0xf   : > { %s2338_s12 = scalar_lea.vmem %s2719_s0, %s1738_s30  ;;  %331 = vst [vmem:[#allocation2] sm:$0x3] (!%p1741_p4), %v1742_v0 }
  0x10   : > { %s2343_s15 = scalar_lea.vmem %s2722_s3, %s2172_s9 }
  0x14 PF: > { %v2352_v1 = vld [vmem:[%s2721_s2 + $0x40] sm:$0xff]   ;;  %v2363_v3 = vld [vmem:[%s2721_s2 + $0x48] sm:$0xff]   ;;  %v2375_v5 = vld [vmem:[%s2721_s2 + $0x50] sm:$0xff]   ;;  %vm486_vm0 = vcmask 1041408   ;;  %v2272_v8 = vmov 0.0   ;;  %vm487_vm1 = vcmask 1042432   ;;  %v377_v9 = vlaneseq }
  0x15   : > { %v2357_v2 = vld [vmem:[%s2721_s2] sm:$0xff]   ;;  %1842 = vmatprep.subr.bf16.mxu0 %v2352_v1  ;;  %v2369_v4 = vld [vmem:[%s2721_s2 + $0x8] sm:$0xff]   ;;  %v2381_v6 = vld [vmem:[%s2721_s2 + $0x10] sm:$0xff]   ;;  %2053 = vmatprep.subr.bf16.mxu1 %v2272_v8  ;;  %v2273_v11 = vmov 65535   ;;  %v2274_v19 = vmov 1966171168  }
  0x16   : > { %1843 = vmatpush3.bf16.msra.mxu0 %v2357_v2  ;;  %v2387_v7 = vld [vmem:[%s2721_s2 + $0x58] sm:$0xff]   ;;  %v488_v12 = vsel %vm486_vm0, 4294967295, %v2273_v11  ;;  %v2400_v13 = vld [vmem:[%s2721_s2 + $0x60] sm:$0xff]   ;;  %v2410_v15 = vld [vmem:[%s2721_s2 + $0x68] sm:$0xff]   ;;  %v378_v17 = vshrl.u32 %v377_v9, 7  ;;  %v375_v20 = vunpack.c.l.s4 %v2274_v19  ;;  %vm482_vm2 = vcmask 957440  }
  0x17   : > { %1844 = vmatprep.subr.bf16.mxu0 %v2363_v3  ;;  %v2394_v10 = vld [vmem:[%s2721_s2 + $0x18] sm:$0xff]   ;;  %v2405_v14 = vld [vmem:[%s2721_s2 + $0x20] sm:$0xff]   ;;  %v489_v16 = vsel %vm487_vm1, %v488_v12, 0  ;;  %v2418_v21 = vld [vmem:[%s2721_s2 + $0x28] sm:$0xff]   ;;  %vm550_vm3 = vcmask 1040384   ;;  %vm2275_vm4 = vmmov 0  }
  0x18   : > { %v1743_v18 = vld.sshfl [vmem:[%s2338_s12] sm:$0x11 pattern:$0x75316420]  ;;  %v2424_v23 = vld [vmem:[%s2721_s2 + $0x70] sm:$0xff]   ;;  %v376_v26 = vunpack.c.0.s8 %v375_v20  ;;  %v2449_v31 = vld [vmem:[%s2721_s2 + $0x38] sm:$0xff]   ;;  %2057 = vmatprep.mubr.msk.bf16.mxu1 %vm2275_vm4, %v2272_v8 }
  0x19   : > { %v2210_v22 = vld [vmem:[%s2343_s15] sm:$0xff]   ;;  %v2208_v24 = vld [vmem:[%s2721_s2 + $0x78] ss:$0 sps:$4 sm:$0x77]   ;;  %v373_v25 = vcombine.high %v1743_v18, %v1743_v18  ;;  %v2437_v28 = vld [vmem:[%s2721_s2 + $0x30] sm:$0xff]   ;;  %vm546_vm5 = vcmask 146432  }
  0x1a   : > { %1845 = vmatpush3.bf16.msra.mxu0 %v2369_v4  ;;  %2054 = vmatpush3.bf16.msra.mxu1 %v2210_v22  ;;  %v2431_v27 = vsub.s32 %v376_v26, %v378_v17  ;;  %v2442_v30 = vand.u32 %v2208_v24, %v489_v16  ;;  %v2211_v33 = vld [vmem:[%s2343_s15 + $0x8] ss:$0 sps:$4 sm:$0x11]   ;;  %v2212_v49 = vld [vmem:[%s2343_s15 + $0xc] sm:$0xff]   ;;  %p1827_p5 = scmp.ne.s32.totalorder %s2330_s28, 3 }
  0x1b   : > { %1846 = vmatprep.subr.bf16.mxu0 %v2375_v5  ;;  %2055 = vmatprep.subr.bf16.mxu1 %v2272_v8  ;;  %v552_v34 = vsel %vm550_vm3, %v2211_v33, 0  ;;  %v1774_v35 = vld.sshfl [vmem:[%s2338_s12 + $0x4] sm:$0x11 pattern:$0x75316420]  ;;  %vm2277_vm6 = vmmov (!%p1827_p5), 0  }
  0x1c   : > { %v387_v29 = vrot.slane %v373_v25, %v2431_v27  ;;  %v380_v32 = vrot.slane %v1743_v18, %v2431_v27  ;;  %v735_v36 = vcombine.high %v1774_v35, %v1774_v35  ;;  %v742_v37 = vrot.slane %v1774_v35, %v2431_v27  ;;  %v1765_v39 = vld.sshfl [vmem:[%s2338_s12 + $0x2] sm:$0x11 pattern:$0x75316420]  ;;  %v2214_v18 = vld [vmem:[%s2343_s15 + $0x18] sm:$0xff]   ;;  %v2216_v33 = vld [vmem:[%s2343_s15 + $0x24] sm:$0xff]  }
  0x1d   : > { %v605_v40 = vcombine.high %v1765_v39, %v1765_v39  ;;  %v612_v48 = vrot.slane %v1765_v39, %v2431_v27  ;;  %v2213_v50 = vld [vmem:[%s2343_s15 + $0x14] ss:$0 sps:$4 sm:$0x11]   ;;  %v2215_v20 = vld [vmem:[%s2343_s15 + $0x20] ss:$0 sps:$4 sm:$0x11]  }
  0x1e   : > { %1847 = vmatpush3.bf16.msra.mxu0 %v2381_v6  ;;  %1760 = vmatprep.mubr.msk.bf16.mxu0 %vm482_vm2, %v387_v29  ;;  %v749_v38 = vrot.slane %v735_v36, %v2431_v27  ;;  %v682_v51 = vsel %vm550_vm3, %v2213_v50, 0  ;;  %v1792_v57 = vld.sshfl [vmem:[%s2338_s12 + $0x8] sm:$0x11 pattern:$0x75316420]  ;;  %v812_v22 = vsel %vm550_vm3, %v2215_v20, 0 }
  0x1f   : > { %1848 = vmatprep.subr.bf16.mxu0 %v2387_v7  ;;  %2056 = vmatpush3.bf16.msra.mxu1 %v552_v34  ;;  %v619_v46 = vrot.slane %v605_v40, %v2431_v27  ;;  %v995_v58 = vcombine.high %v1792_v57, %v1792_v57  ;;  %v1002_v60 = vrot.slane %v1792_v57, %v2431_v27  ;;  %v1801_v61 = vld.sshfl [vmem:[%s2338_s12 + $0xa] sm:$0x11 pattern:$0x75316420]  ;;  %vm1533_vm7 = vcmask (!%p1827_p5), 1043456  }
  0x20   : > { %1867 = vmatprep.subr.bf16.mxu1 %v2352_v1  ;;  %v1125_v62 = vcombine.high %v1801_v61, %v1801_v61  ;;  %v1132_v0 = vrot.slane %v1801_v61, %v2431_v27  ;;  %v1783_v24 = vld.sshfl [vmem:[%s2338_s12 + $0x6] sm:$0x11 pattern:$0x75316420]  ;;  %vm1529_vm8 = vcmask (!%p1827_p5), 64512   ;;  %vm1673_vm9 = vcmask (!%p1827_p5), 17408  }
  0x21   : > { %v1009_v59 = vrot.slane %v995_v58, %v2431_v27  ;;  %v865_v25 = vcombine.high %v1783_v24, %v1783_v24  ;;  %v2217_v39 = vld [vmem:[%s2343_s15 + $0x2c] ss:$0 sps:$4 sm:$0x11]   ;;  %v2219_v57 = vld [vmem:[%s2343_s15 + $0x38] ss:$0 sps:$4 sm:$0x11]  }
  0x22   : > { %1849 = vmatpush3.bf16.msra.mxu0 %v2394_v10  ;;  %v1139_v63 = vrot.slane %v1125_v62, %v2431_v27  ;;  %v942_v40 = vsel %vm550_vm3, %v2217_v39, 0  ;;  %v1072_v58 = vsel %vm550_vm3, %v2219_v57, 0  ;;  %v2221_v61 = vld [vmem:[%s2343_s15 + $0x44] ss:$0 sps:$4 sm:$0x11]   ;;  %v2233_v39 = vld [vmem:[%s2724_s5 + $0x38] sm:$0xff] (!%p1827_p5)  }
  0x23   : > { %1850 = vmatprep.subr.bf16.mxu0 %v2400_v13  ;;  %v879_v29 = vrot.slane %v865_v25, %v2431_v27  ;;  %v1202_v62 = vsel %vm550_vm3, %v2221_v61, 0  ;;  %v2276_v25 = vmov (!%p1827_p5), 0.0  }
  0x26   : > { %1851 = vmatpush3.bf16.msra.mxu0 %v2405_v14 }
  0x27   : > { %1852 = vmatprep.subr.bf16.mxu0 %v2410_v15 }
  0x2a   : > { %1853 = vmatpush3.bf16.msra.mxu0 %v2418_v21 }
  0x2b   : > { %1854 = vmatprep.subr.bf16.mxu0 %v2424_v23 }
  0x2e   : > { %1855 = vmatpush3.bf16.msra.mxu0 %v2437_v28 }
  0x2f   : > { %1856 = vmatprep.subr.bf16.mxu0 %v2442_v30 }
  0x32   : > { %1857 = vmatpush3.bf16.msra.mxu0 %v2449_v31 }
  0x33   : > { %1892 = vmatprep.subr.bf16.mxu0 %v2352_v1 }
  0x35   : > { %526 = vmatmul.mubr.bf16.vlgmr.msra.gmra.mrb[0].mxu0 %v380_v32  ;;  %v872_v32 = vrot.slane %v1783_v24, %v2431_v27 }
  0x36   : > { %1893 = vmatpush3.bf16.msra.mxu0 %v2357_v2  ;;  %1775 = vmatprep.mubr.msk.bf16.mxu0 %vm482_vm2, %v749_v38 }
  0x37   : > { %1894 = vmatprep.subr.bf16.mxu0 %v2363_v3 }
  0x3a   : > { %1895 = vmatpush3.bf16.msra.mxu0 %v2369_v4 }
  0x3b   : > { %1896 = vmatprep.subr.bf16.mxu0 %v2375_v5 }
  0x3e   : > { %1897 = vmatpush3.bf16.msra.mxu0 %v2381_v6 }
  0x3f   : > { %1898 = vmatprep.subr.bf16.mxu0 %v2387_v7 }
  0x42   : > { %1899 = vmatpush3.bf16.msra.mxu0 %v2394_v10 }
  0x43   : > { %1900 = vmatprep.subr.bf16.mxu0 %v2400_v13 }
  0x46   : > { %1901 = vmatpush3.bf16.msra.mxu0 %v2405_v14 }
  0x47   : > { %1902 = vmatprep.subr.bf16.mxu0 %v2410_v15 }
  0x4a   : > { %1903 = vmatpush3.bf16.msra.mxu0 %v2418_v21 }
  0x4b   : > { %1904 = vmatprep.subr.bf16.mxu0 %v2424_v23 }
  0x4e   : > { %1905 = vmatpush3.bf16.msra.mxu0 %v2437_v28 }
  0x4f   : > { %1906 = vmatprep.subr.bf16.mxu0 %v2442_v30 }
  0x52   : > { %1907 = vmatpush3.bf16.msra.mxu0 %v2449_v31 }
  0x53   : > { %1942 = vmatprep.subr.bf16.mxu0 %v2352_v1 }
  0x55   : > { %787 = vmatmul.mubr.bf16.vlgmr.msra.gmra.mrb[4].mxu0 %v742_v37 }
  0x56   : > { %1943 = vmatpush3.bf16.msra.mxu0 %v2357_v2  ;;  %1793 = vmatprep.mubr.msk.bf16.mxu0 %vm482_vm2, %v1009_v59  ;;  %v2220_v59 = vld [vmem:[%s2343_s15 + $0x3c] sm:$0xff]  }
  0x57   : > { %1944 = vmatprep.subr.bf16.mxu0 %v2363_v3 }
  0x5a   : > { %1945 = vmatpush3.bf16.msra.mxu0 %v2369_v4 }
  0x5b   : > { %1946 = vmatprep.subr.bf16.mxu0 %v2375_v5 }
  0x5e   : > { %1947 = vmatpush3.bf16.msra.mxu0 %v2381_v6 }
  0x5f   : > { %1948 = vmatprep.subr.bf16.mxu0 %v2387_v7 }
  0x62   : > { %1949 = vmatpush3.bf16.msra.mxu0 %v2394_v10 }
  0x63   : > { %1950 = vmatprep.subr.bf16.mxu0 %v2400_v13 }
  0x66   : > { %1951 = vmatpush3.bf16.msra.mxu0 %v2405_v14 }
  0x67   : > { %1952 = vmatprep.subr.bf16.mxu0 %v2410_v15 }
  0x6a   : > { %1953 = vmatpush3.bf16.msra.mxu0 %v2418_v21 }
  0x6b   : > { %1954 = vmatprep.subr.bf16.mxu0 %v2424_v23 }
  0x6e   : > { %1955 = vmatpush3.bf16.msra.mxu0 %v2437_v28 }
  0x6f   : > { %1956 = vmatprep.subr.bf16.mxu0 %v2442_v30 }
  0x72   : > { %1957 = vmatpush3.bf16.msra.mxu0 %v2449_v31 }
  0x73   : > { %1967 = vmatprep.subr.bf16.mxu0 %v2352_v1 }
  0x75   : > { %1047 = vmatmul.mubr.bf16.vlgmr.msra.gmra.mrb[8].mxu0 %v1002_v60 }
  0x76   : > { %1968 = vmatpush3.bf16.msra.mxu0 %v2357_v2  ;;  %1802 = vmatprep.mubr.msk.bf16.mxu0 %vm482_vm2, %v1139_v63  ;;  %v1810_v63 = vld.sshfl [vmem:[%s2338_s12 + $0xc] sm:$0x11 pattern:$0x75316420] }
  0x77   : > { %1969 = vmatprep.subr.bf16.mxu0 %v2363_v3 }
  0x7a   : > { %1970 = vmatpush3.bf16.msra.mxu0 %v2369_v4 }
  0x7b   : > { %1971 = vmatprep.subr.bf16.mxu0 %v2375_v5 }
  0x7e   : > { %1972 = vmatpush3.bf16.msra.mxu0 %v2381_v6 }
  0x7f   : > { %1973 = vmatprep.subr.bf16.mxu0 %v2387_v7 }
  0x82   : > { %1974 = vmatpush3.bf16.msra.mxu0 %v2394_v10 }
  0x83   : > { %1975 = vmatprep.subr.bf16.mxu0 %v2400_v13 }
  0x86   : > { %1976 = vmatpush3.bf16.msra.mxu0 %v2405_v14 }
  0x87   : > { %1977 = vmatprep.subr.bf16.mxu0 %v2410_v15 }
  0x8a   : > { %1978 = vmatpush3.bf16.msra.mxu0 %v2418_v21 }
  0x8b   : > { %1979 = vmatprep.subr.bf16.mxu0 %v2424_v23 }
  0x8e   : > { %1980 = vmatpush3.bf16.msra.mxu0 %v2437_v28 }
  0x8f   : > { %1981 = vmatprep.subr.bf16.mxu0 %v2442_v30 }
  0x92   : > { %1982 = vmatpush3.bf16.msra.mxu0 %v2449_v31 }
  0x93   : > { %2017 = vmatprep.subr.bf16.mxu0 %v2352_v1 }
  0x95   : > { %1177 = vmatmul.mubr.bf16.vlgmr.msra.gmra.mrb[12].mxu0 %v1132_v0  ;;  %v1255_v0 = vcombine.high %v1810_v63, %v1810_v63 }
  0x96   : > { %2018 = vmatpush3.bf16.msra.mxu0 %v2357_v2 }
  0x97   : > { %2019 = vmatprep.subr.bf16.mxu0 %v2363_v3 }
  0x9a   : > { %2020 = vmatpush3.bf16.msra.mxu0 %v2369_v4 }
  0x9b   : > { %2021 = vmatprep.subr.bf16.mxu0 %v2375_v5 }
  0x9e   : > { %2022 = vmatpush3.bf16.msra.mxu0 %v2381_v6 }
  0x9f   : > { %2023 = vmatprep.subr.bf16.mxu0 %v2387_v7 }
  0xa2   : > { %2024 = vmatpush3.bf16.msra.mxu0 %v2394_v10 }
  0xa3   : > { %2025 = vmatprep.subr.bf16.mxu0 %v2400_v13 }
  0xa6   : > { %2026 = vmatpush3.bf16.msra.mxu0 %v2405_v14 }
  0xa7   : > { %2027 = vmatprep.subr.bf16.mxu0 %v2410_v15 }
  0xaa   : > { %2028 = vmatpush3.bf16.msra.mxu0 %v2418_v21 }
  0xab   : > { %2029 = vmatprep.subr.bf16.mxu0 %v2424_v23 }
  0xae   : > { %2030 = vmatpush3.bf16.msra.mxu0 %v2437_v28 }
  0xaf   : > { %2031 = vmatprep.subr.bf16.mxu0 %v2442_v30 }
  0xb2   : > { %2032 = vmatpush3.bf16.msra.mxu0 %v2449_v31 }
  0xb3   : > { %2117 = vmatprep.subr.bf16.mxu0 (!%p1827_p5), %v2276_v25 }
 0x108   : > { %v1858_v41 = vpop.f32.mrb[0].mxu0 }
 0x109   : > { %v1859_v42 = vpop.f32.mrb[1].mxu0 }
 0x10a   : > { %v1860_v43 = vadd.f32 %v1859_v42, %v1858_v41  ;;  %v1861_v44 = vpop.f32.mrb[2].mxu0 }
 0x10b   : > { %v1862_v45 = vpop.f32.mrb[3].mxu0 }
 0x10c   : > { %v533_v47 = vpack.c.bf16 %v1860_v43, %v1860_v43 }
 0x10e   : > { %2058 = vmatmul.mubr.msk.bf16.vlgmr.msra.gmra.mrb[0].mxu1 %vm546_vm5, %v533_v47 }
 0x10f   : > { %1868 = vmatpush3.bf16.msra.mxu1 %v2357_v2  ;;  %1766 = vmatprep.mubr.msk.bf16.mxu1 %vm482_vm2, %v619_v46  ;;  %v1819_v46 = vld.sshfl [vmem:[%s2338_s12 + $0xe] sm:$0x11 pattern:$0x75316420] }
 0x110   : > { %1869 = vmatprep.subr.bf16.mxu1 %v2363_v3  ;;  %v1385_v47 = vcombine.high %v1819_v46, %v1819_v46 }
 0x113   : > { %1870 = vmatpush3.bf16.msra.mxu1 %v2369_v4 }
 0x114   : > { %1871 = vmatprep.subr.bf16.mxu1 %v2375_v5 }
 0x117   : > { %1872 = vmatpush3.bf16.msra.mxu1 %v2381_v6 }
 0x118   : > { %1873 = vmatprep.subr.bf16.mxu1 %v2387_v7 }
 0x11b   : > { %1874 = vmatpush3.bf16.msra.mxu1 %v2394_v10 }
 0x11c   : > { %1875 = vmatprep.subr.bf16.mxu1 %v2400_v13 }
 0x11f   : > { %1876 = vmatpush3.bf16.msra.mxu1 %v2405_v14 }
 0x120   : > { %1877 = vmatprep.subr.bf16.mxu1 %v2410_v15 }
 0x123   : > { %1878 = vmatpush3.bf16.msra.mxu1 %v2418_v21 }
 0x124   : > { %1879 = vmatprep.subr.bf16.mxu1 %v2424_v23 }
 0x127   : > { %1880 = vmatpush3.bf16.msra.mxu1 %v2437_v28 }
 0x128   : > { %1881 = vmatprep.subr.bf16.mxu1 %v2442_v30  ;;  %v1908_v52 = vpop.f32.mrb[4].mxu0 }
 0x129   : > { %v1909_v53 = vpop.f32.mrb[5].mxu0 }
 0x12a   : > { %v2524_v54 = vadd.f32 %v1909_v53, %v1908_v52  ;;  %v1911_v55 = vpop.f32.mrb[6].mxu0 }
 0x12b   : > { %1882 = vmatpush3.bf16.msra.mxu1 %v2449_v31  ;;  %v1912_v56 = vpop.f32.mrb[7].mxu0  ;;  %v2218_v55 = vld [vmem:[%s2343_s15 + $0x30] sm:$0xff]  }
 0x12c   : > { %2061 = vmatprep.subr.bf16.mxu1 %v2272_v8  ;;  %v794_v26 = vpack.c.bf16 %v2524_v54, %v2524_v54 }
 0x12e   : > { %657 = vmatmul.mubr.bf16.vlgmr.msra.gmra.mrb[4].mxu1 %v612_v48  ;;  %v1392_v48 = vrot.slane %v1819_v46, %v2431_v27  ;;  %v1837_v46 = vld [vmem:[%s2726_s7] ss:$0 sm:$0xff] (!%p1827_p5) }
 0x12f   : > { %2062 = vmatpush3.bf16.msra.mxu1 %v2212_v49  ;;  %2065 = vmatprep.mubr.msk.bf16.mxu1 %vm2275_vm4, %v2272_v8  ;;  %v1399_v49 = vrot.slane %v1385_v47, %v2431_v27 }
 0x130   : > { %2063 = vmatprep.subr.bf16.mxu1 %v2272_v8 }
 0x131   : > { %1820 = vmatprep.mubr.msk.bf16.mxu0 %vm482_vm2, %v1399_v49 }
 0x132   : > { %1437 = vmatmul.mubr.bf16.vlgmr.msra.gmra.mrb[16].mxu0 %v1392_v48 }
 0x133   : > { %2064 = vmatpush3.bf16.msra.mxu1 %v682_v51  ;;  %2119 = vmatprep.mubr.msk.bf16.mxu0 (!%p1827_p5), %vm2277_vm6, %v2276_v25 }
 0x134   : > { %2069 = vmatprep.subr.bf16.mxu1 %v2272_v8 }
 0x148   : > { %v1958_v34 = vpop.f32.mrb[8].mxu0 }
 0x149   : > { %v1959_v35 = vpop.f32.mrb[9].mxu0 }
 0x14a   : > { %v1960_v36 = vadd.f32 %v1959_v35, %v1958_v34  ;;  %v1961_v37 = vpop.f32.mrb[10].mxu0  ;;  %v1527_v34 = vld [vmem:[%s2720_s1] sm:$0x1] (!%p1827_p5)  ;;  %v2229_v35 = vld [vmem:[%s2724_s5 + $0x18] sm:$0xff] (!%p1827_p5)  }
 0x14b   : > { %v1962_v38 = vpop.f32.mrb[11].mxu0  ;;  %v2231_v37 = vld [vmem:[%s2724_s5 + $0x28] sm:$0xff] (!%p1827_p5)  }
 0x14c   : > { %v1054_v60 = vpack.c.bf16 %v1960_v36, %v1960_v36  ;;  %v2230_v36 = vld [vmem:[%s2724_s5 + $0x20] sm:$0xff] (!%p1827_p5)   ;;  %v2232_v38 = vld [vmem:[%s2724_s5 + $0x30] sm:$0xff] (!%p1827_p5)  }
 0x168   : > { %v1983_v41 = vpop.f32.mrb[12].mxu0 }
 0x169   : > { %v1984_v42 = vpop.f32.mrb[13].mxu0 }
 0x16a   : > { %v1985_v43 = vadd.f32 %v1984_v42, %v1983_v41  ;;  %v1986_v44 = vpop.f32.mrb[14].mxu0 }
 0x16b   : > { %v1987_v45 = vpop.f32.mrb[15].mxu0 }
 0x201   : > { %v1883_v9 = vpop.f32.mrb[4].mxu1 }
 0x202   : > { %v1884_v11 = vpop.f32.mrb[5].mxu1 }
 0x203   : > { %v1885_v12 = vadd.f32 %v1884_v11, %v1883_v9  ;;  %v1886_v16 = vpop.f32.mrb[6].mxu1  ;;  %v1184_v9 = vpack.c.bf16 %v1985_v43, %v1985_v43  ;;  %v1269_v11 = vrot.slane %v1255_v0, %v2431_v27 }
 0x204   : > { %v1887_v17 = vpop.f32.mrb[7].mxu1 }
 0x205   : > { %v664_v19 = vpack.c.bf16 %v1885_v12, %v1885_v12  ;;  %v332_v17 = vld [vmem:[#allocation2] sm:$0x3] }
 0x207   : > { %2066 = vmatmul.mubr.msk.bf16.vlgmr.msra.gmra.mrb[0].mxu1 %vm546_vm5, %v664_v19 }
 0x208   : > { %2070 = vmatpush3.bf16.msra.mxu1 %v2214_v18  ;;  %2073 = vmatprep.mubr.msk.bf16.mxu1 %vm2275_vm4, %v2272_v8 }
 0x209   : > { %2071 = vmatprep.subr.bf16.mxu1 %v2272_v8 }
 0x20c   : > { %2072 = vmatpush3.bf16.msra.mxu1 %v812_v22 }
 0x20d   : > { %1917 = vmatprep.subr.bf16.mxu1 %v2352_v1 }
 0x213   : > { %2074 = vmatmul.mubr.msk.bf16.vlgmr.msra.gmra.mrb[0].mxu1 %vm546_vm5, %v794_v26  ;;  %v2227_v26 = vld [vmem:[%s2724_s5 + $0x8] sm:$0xff] (!%p1827_p5)  }
 0x214   : > { %1918 = vmatpush3.bf16.msra.mxu1 %v2357_v2  ;;  %1784 = vmatprep.mubr.msk.bf16.mxu1 %vm482_vm2, %v879_v29  ;;  %v2228_v29 = vld [vmem:[%s2724_s5 + $0x10] sm:$0xff] (!%p1827_p5)  }
 0x215   : > { %1919 = vmatprep.subr.bf16.mxu1 %v2363_v3 }
 0x218   : > { %1920 = vmatpush3.bf16.msra.mxu1 %v2369_v4 }
 0x219   : > { %1921 = vmatprep.subr.bf16.mxu1 %v2375_v5 }
 0x21c   : > { %1922 = vmatpush3.bf16.msra.mxu1 %v2381_v6 }
 0x21d   : > { %1923 = vmatprep.subr.bf16.mxu1 %v2387_v7 }
 0x220   : > { %1924 = vmatpush3.bf16.msra.mxu1 %v2394_v10 }
 0x221   : > { %1925 = vmatprep.subr.bf16.mxu1 %v2400_v13 }
 0x224   : > { %1926 = vmatpush3.bf16.msra.mxu1 %v2405_v14 }
 0x225   : > { %1927 = vmatprep.subr.bf16.mxu1 %v2410_v15 }
 0x228   : > { %1928 = vmatpush3.bf16.msra.mxu1 %v2418_v21 }
 0x229   : > { %1929 = vmatprep.subr.bf16.mxu1 %v2424_v23 }
 0x22c   : > { %1930 = vmatpush3.bf16.msra.mxu1 %v2437_v28 }
 0x22d   : > { %1931 = vmatprep.subr.bf16.mxu1 %v2442_v30 }
 0x230   : > { %1932 = vmatpush3.bf16.msra.mxu1 %v2449_v31 }
 0x231   : > { %2077 = vmatprep.subr.bf16.mxu1 %v2272_v8 }
 0x233   : > { %917 = vmatmul.mubr.bf16.vlgmr.msra.gmra.mrb[8].mxu1 %v872_v32  ;;  %v1528_v32 = vld [vmem:[%s2725_s6] sm:$0xf] (!%p1827_p5) }
 0x234   : > { %2078 = vmatpush3.bf16.msra.mxu1 %v2216_v33  ;;  %2081 = vmatprep.mubr.msk.bf16.mxu1 %vm2275_vm4, %v2272_v8  ;;  %v1535_v33 = vsel (!%p1827_p5), %vm1533_vm7, %v1528_v32, 0 }
 0x235   : > { %2079 = vmatprep.subr.bf16.mxu1 %v2272_v8  ;;  %2118 = vmatpush3.bf16.msra.mxu0 (!%p1827_p5), %v1535_v33 }
 0x238   : > { %2080 = vmatpush3.bf16.msra.mxu1 %v942_v40  ;;  %2120 = vmatmul.mubr.msk.bf16.vlgmr.msra.gmra.mrb[0].mxu0 (!%p1827_p5), %vm1529_vm8, %v1527_v34 }
 0x239   : > { %2085 = vmatprep.subr.bf16.mxu1 %v2272_v8 }
 0x306   : > { %v1933_v50 = vpop.f32.mrb[8].mxu1 }
 0x307   : > { %v1934_v51 = vpop.f32.mrb[9].mxu1 }
 0x308   : > { %v1935_v52 = vadd.f32 %v1934_v51, %v1933_v50  ;;  %v1936_v53 = vpop.f32.mrb[10].mxu1 }
 0x309   : > { %v1937_v54 = vpop.f32.mrb[11].mxu1 }
 0x30a   : > { %v924_v56 = vpack.c.bf16 %v1935_v52, %v1935_v52 }
 0x30c   : > { %2082 = vmatmul.mubr.msk.bf16.vlgmr.msra.gmra.mrb[0].mxu1 %vm546_vm5, %v924_v56 }
 0x30d   : > { %2086 = vmatpush3.bf16.msra.mxu1 %v2218_v55  ;;  %2089 = vmatprep.mubr.msk.bf16.mxu1 %vm2275_vm4, %v2272_v8 }
 0x30e   : > { %2087 = vmatprep.subr.bf16.mxu1 %v2272_v8 }
 0x311   : > { %2088 = vmatpush3.bf16.msra.mxu1 %v1072_v58 }
 0x312   : > { %2093 = vmatprep.subr.bf16.mxu1 %v2272_v8 }
 0x318   : > { %2090 = vmatmul.mubr.msk.bf16.vlgmr.msra.gmra.mrb[0].mxu1 %vm546_vm5, %v1054_v60 }
 0x319   : > { %2094 = vmatpush3.bf16.msra.mxu1 %v2220_v59  ;;  %2097 = vmatprep.mubr.msk.bf16.mxu1 %vm2275_vm4, %v2272_v8 }
 0x31a   : > { %2095 = vmatprep.subr.bf16.mxu1 %v2272_v8 }
 0x31d   : > { %2096 = vmatpush3.bf16.msra.mxu1 %v1202_v62 }
 0x31e   : > { %1992 = vmatprep.subr.bf16.mxu1 %v2352_v1  ;;  %v1262_v1 = vrot.slane %v1810_v63, %v2431_v27 }
 0x324   : > { %2098 = vmatmul.mubr.msk.bf16.vlgmr.msra.gmra.mrb[0].mxu1 %vm546_vm5, %v1184_v9 }
 0x325   : > { %1993 = vmatpush3.bf16.msra.mxu1 %v2357_v2  ;;  %1811 = vmatprep.mubr.msk.bf16.mxu1 %vm482_vm2, %v1269_v11  ;;  %v2222_v2 = vld [vmem:[%s2343_s15 + $0x48] sm:$0xff]  }
 0x326   : > { %1994 = vmatprep.subr.bf16.mxu1 %v2363_v3  ;;  %v2223_v3 = vld [vmem:[%s2343_s15 + $0x50] ss:$0 sps:$4 sm:$0x11]  }
 0x329   : > { %1995 = vmatpush3.bf16.msra.mxu1 %v2369_v4  ;;  %v1332_v4 = vsel %vm550_vm3, %v2223_v3, 0 }
 0x32a   : > { %1996 = vmatprep.subr.bf16.mxu1 %v2375_v5  ;;  %v2033_v5 = vpop.f32.mrb[16].mxu0 }
 0x32d   : > { %1997 = vmatpush3.bf16.msra.mxu1 %v2381_v6  ;;  %v2034_v6 = vpop.f32.mrb[17].mxu0 }
 0x32e   : > { %1998 = vmatprep.subr.bf16.mxu1 %v2387_v7  ;;  %v2035_v7 = vadd.f32 %v2034_v6, %v2033_v5 }
 0x330   : > { %v1444_v16 = vpack.c.bf16 %v2035_v7, %v2035_v7 }
 0x331   : > { %1999 = vmatpush3.bf16.msra.mxu1 %v2394_v10  ;;  %v2036_v10 = vpop.f32.mrb[18].mxu0 }
 0x332   : > { %2000 = vmatprep.subr.bf16.mxu1 %v2400_v13  ;;  %v2037_v13 = vpop.f32.mrb[19].mxu0 }
 0x333   : > { %v1571_v41 = vpop.f32.mrb[0].mxu0 (!%p1827_p5) }
 0x334   : > { %v2121_v42 = vpop.f32.mrb[1].mxu0 (!%p1827_p5) }
 0x335   : > { %2001 = vmatpush3.bf16.msra.mxu1 %v2405_v14  ;;  %v1574_v43 = vpop.f32.mrb[2].mxu0 (!%p1827_p5) }
 0x336   : > { %2002 = vmatprep.subr.bf16.mxu1 %v2410_v15  ;;  %v2122_v44 = vpop.f32.mrb[3].mxu0 (!%p1827_p5) }
 0x339   : > { %2003 = vmatpush3.bf16.msra.mxu1 %v2418_v21 }
 0x33a   : > { %2004 = vmatprep.subr.bf16.mxu1 %v2424_v23 }
 0x33d   : > { %2005 = vmatpush3.bf16.msra.mxu1 %v2437_v28  ;;  %v2224_v28 = vld [vmem:[%s2343_s15 + $0x54] sm:$0xff]  }
 0x33e   : > { %2006 = vmatprep.subr.bf16.mxu1 %v2442_v30 }
 0x341   : > { %2007 = vmatpush3.bf16.msra.mxu1 %v2449_v31  ;;  %v2225_v31 = vld [vmem:[%s2343_s15 + $0x5c] ss:$0 sps:$4 sm:$0x11]  }
 0x342   : > { %2101 = vmatprep.subr.bf16.mxu1 %v2272_v8  ;;  %v1462_v12 = vsel %vm550_vm3, %v2225_v31, 0 }
 0x344   : > { %1307 = vmatmul.mubr.bf16.vlgmr.msra.gmra.mrb[12].mxu1 %v1262_v1 }
 0x345   : > { %2102 = vmatpush3.bf16.msra.mxu1 %v2222_v2  ;;  %2105 = vmatprep.mubr.msk.bf16.mxu1 %vm2275_vm4, %v2272_v8 }
 0x346   : > { %2103 = vmatprep.subr.bf16.mxu1 %v2272_v8 }
 0x349   : > { %2104 = vmatpush3.bf16.msra.mxu1 %v1332_v4 }
 0x34a   : > { %2109 = vmatprep.subr.bf16.mxu1 %v2272_v8 }
 0x417   : > { %v2008_v14 = vpop.f32.mrb[12].mxu1 }
 0x418   : > { %v2009_v15 = vpop.f32.mrb[13].mxu1 }
 0x419   : > { %v2010_v21 = vadd.f32 %v2009_v15, %v2008_v14  ;;  %v2011_v23 = vpop.f32.mrb[14].mxu1 }
 0x41a   : > { %v2012_v27 = vpop.f32.mrb[15].mxu1 }
 0x41b   : > { %v1314_v30 = vpack.c.bf16 %v2010_v21, %v2010_v21 }
 0x41d   : > { %2106 = vmatmul.mubr.msk.bf16.vlgmr.msra.gmra.mrb[0].mxu1 %vm546_vm5, %v1314_v30 }
 0x41e   : > { %2110 = vmatpush3.bf16.msra.mxu1 %v2224_v28  ;;  %2113 = vmatprep.mubr.msk.bf16.mxu1 %vm2275_vm4, %v2272_v8 }
 0x41f   : > { %2111 = vmatprep.subr.bf16.mxu1 %v2272_v8  ;;  %v2226_v8 = vld [vmem:[%s2724_s5] sm:$0xff] (!%p1827_p5)  }
 0x422   : > { %2112 = vmatpush3.bf16.msra.mxu1 %v1462_v12 }
 0x423   : > { %2123 = vmatprep.subr.bf16.mxu1 (!%p1827_p5), %v2276_v25 }
 0x429   : > { %2114 = vmatmul.mubr.msk.bf16.vlgmr.msra.gmra.mrb[0].mxu1 %vm546_vm5, %v1444_v16 }
 0x42a   : > { %2124 = vmatpush3.bf16.msra.mxu1 (!%p1827_p5), %v2226_v8  ;;  %2139 = vmatprep.mubr.msk.bf16.mxu1 (!%p1827_p5), %vm2277_vm6, %v2276_v25 }
 0x42b   : > { %2125 = vmatprep.subr.bf16.mxu1 (!%p1827_p5), %v2276_v25 }
 0x42e   : > { %2126 = vmatpush3.bf16.msra.mxu1 (!%p1827_p5), %v2227_v26 }
 0x42f   : > { %2127 = vmatprep.subr.bf16.mxu1 (!%p1827_p5), %v2276_v25 }
 0x432   : > { %2128 = vmatpush3.bf16.msra.mxu1 (!%p1827_p5), %v2228_v29 }
 0x433   : > { %2129 = vmatprep.subr.bf16.mxu1 (!%p1827_p5), %v2276_v25 }
 0x436   : > { %2130 = vmatpush3.bf16.msra.mxu1 (!%p1827_p5), %v2229_v35 }
 0x437   : > { %2131 = vmatprep.subr.bf16.mxu1 (!%p1827_p5), %v2276_v25 }
 0x43a   : > { %2132 = vmatpush3.bf16.msra.mxu1 (!%p1827_p5), %v2230_v36 }
 0x43b   : > { %2133 = vmatprep.subr.bf16.mxu1 (!%p1827_p5), %v2276_v25 }
 0x43e   : > { %2134 = vmatpush3.bf16.msra.mxu1 (!%p1827_p5), %v2231_v37 }
 0x43f   : > { %2135 = vmatprep.subr.bf16.mxu1 (!%p1827_p5), %v2276_v25 }
 0x442   : > { %2136 = vmatpush3.bf16.msra.mxu1 (!%p1827_p5), %v2232_v38 }
 0x443   : > { %2137 = vmatprep.subr.bf16.mxu1 (!%p1827_p5), %v2276_v25 }
 0x446   : > { %2138 = vmatpush3.bf16.msra.mxu1 (!%p1827_p5), %v2233_v39 }
 0x4f9   : > { %1509 = sbr.rel (%p1827_p5) target bundleno = 1498 (0x5da), region = 60 }
 0x4fc   : > { %v1498_v18 = vpop.f32.mrb[0].mxu1 }
 0x4fd   : > { %v2143_v19 = vadd.f32 %v1498_v18, %v332_v17  ;;  %v2115_v20 = vpop.f32.mrb[1].mxu1 }
 0x4fe   : > { %v1501_v22 = vpop.f32.mrb[2].mxu1 }
 0x4ff   : > { %1505 = vst [vmem:[#allocation2] sm:$0x3] %v2143_v19  ;;  %v2116_v24 = vpop.f32.mrb[3].mxu1  ;;  %v1510_v40 = vpack.c.bf16 (!%p1827_p5), %v2143_v19, %v2143_v19 }
 0x501   : > { %2140 = vmatmul.mubr.bf16.vlgmr.msra.gmra.mrb[0].mxu1 %v1510_v40 }
 0x5d4   : > { %v1659_v45 = vpop.f32.mrb[0].mxu1 }
 0x5d5   : > { %v1660_v47 = vadd.f32 %v1659_v45, %v1571_v41  ;;  %v2141_v48 = vpop.f32.mrb[1].mxu1 }
 0x5d6   : > { %v1662_v49 = vpop.f32.mrb[2].mxu1 }
 0x5d7   : > { %v1672_v50 = vadd.f32 %v1837_v46, %v1660_v47  ;;  %v2142_v51 = vpop.f32.mrb[3].mxu1 }
 0x5d9   : > { %1674 = vst.msk [vmem:[#allocation3] sm:$0x3] %vm1673_vm9, %v1672_v50 }
 0x5da PF: > { %p2177_p6 = scmp.eq.s32.totalorder %s2330_s28, 3  ;;  %s2278_s13 = smov [#allocation3]  }
 0x5db   : > { %s1682_s14 = sshll.u32 %s2278_s13, 4  ;;  %s1683_s14 = int_to_ptr.vmem [resolvable:$true] %s1682_s14 }
 0x5dc   : > { %s2234_s16 = scalar_lea.vmem %s1683_s14, 32  ;;  %p2241_p10 = scmp.lt.s32.totalorder %s1683_s14, %s1683_s14 }
 0x5dd   : > { %p2235_p7 = scmp.ne.s32.totalorder %s1683_s14, %s2234_s16  ;;  %p2242_p11 = scmp.lt.s32.totalorder %s2234_s16, %s2234_s16 }
 0x5df   : > { %p2236_p8 = pnand %p2235_p7, %p2177_p6  ;;  %p2243_p12 = por %p2242_p11, %p2241_p10 }
 0x5e1   : > { %p2237_p9 = pneg %p2236_p8 }
 0x5e3   : > { %p2244_p13 = pnand %p2243_p12, %p2237_p9 }
 0x5e5   : > { %2247 = shalt.err (!%p2244_p13)
}
 0x5e6   : > { %s2248_s19 = scalar_lea.hbm %s2727_s8, 32 }
 0x5e7   : > { %p2249_p0 = scmp.ne.s32.totalorder %s2727_s8, %s2248_s19  ;;  %p2254_p3 = scmp.lt.u32.totalorder %s2248_s19, %s2727_s8 }
 0x5e9   : > { %p2250_p1 = pnand %p2249_p0, %p2177_p6 }
 0x5eb   : > { %p2251_p2 = pneg %p2250_p1 }
 0x5ed   : > { %p2256_p4 = pnand %p2254_p3, %p2251_p2 }
 0x5ef   : > { %2259 = shalt.err (!%p2256_p4)
}
 0x5f0   : > { %2174 = dma.vmem_to_hbm [thread:$0]  (%p2177_p6), %s1683_s14, 32, %s2727_s8, [#allocation4]  }
 0x5f1   : > { %2265 = dma.done.wait (%p2177_p6), [#allocation4], 32  }
 0x5f2   : > { %2267 = vsyncadd (%p2177_p6), [#allocation4], 4294967264 }
 0x5f3 PF: > { %s19_s27 = sadd.s32 1, %s2270_s27  }
 0x5f4   : > { %p16_p5 = scmp.ge.s32.totalorder %s19_s27, 6  }
 0x5f6   :  { %18 = sbr.rel (!%p16_p5) target bundleno = 1 (0x1), region = 104 }
 0x5fd   :  { %1695 = vsyncpa [#allocation4], 1 }
 0x5fe   :  { %1697 = vsyncpa [#allocation4 + $0x1], 1 }

</bundles_post_ra>
